<compile_context>
chip_gen: v5e
topology: v5e:2x2
jax: 0.10.0
libtpu: 0.0.40
codegen_flags: <defaults>
</compile_context>

<pallas_src>
import functools
import math

import jax
import jax.numpy as jnp
from jax import lax
from jax.experimental import pallas as pl
from jax.experimental.pallas import tpu as pltpu


def _round_up(x, m):
    return ((x + m - 1) // m) * m


def _cdiv(a, b):
    return -(-a // b)


def _resident_table_spec(block_shape, index_map):
    """Full-table BlockSpec with a constant index_map.

    The block never changes across the grid, so it is DMA'd HBM->VMEM exactly
    once and stays resident; single-buffer it (double-buffering a constant
    block only wastes VMEM).
    """
    try:
        return pl.BlockSpec(block_shape, index_map, pipeline_mode=pl.Buffered(1))
    except (TypeError, AttributeError, ValueError):
        # Older JAX without pipeline_mode / Buffered: default (double) buffering.
        return pl.BlockSpec(block_shape, index_map)


# ---------------------------------------------------------------------------
# Kernel 1: small vocab -> one-hot @ table on the MXU.
# ---------------------------------------------------------------------------
def _embed_onehot_kernel(ids_ref, table_ref, out_ref, *, scale):
    # ids_ref  : VMEM (tok, 1) int32
    # table_ref: VMEM (vocab, d_model), resident
    # out_ref  : VMEM (tok, d_model)
    vocab = table_ref.shape[0]
    ids = ids_ref[...]                                           # (tok, 1)
    iota = lax.broadcasted_iota(jnp.int32, (ids.shape[0], vocab), 1)
    onehot = (ids == iota).astype(table_ref.dtype)               # (tok, vocab)
    rows = jnp.dot(onehot, table_ref[...],
                   preferred_element_type=jnp.float32,
                   precision=jax.lax.Precision.HIGHEST)
    out_ref[...] = (rows * scale).astype(out_ref.dtype)


# ---------------------------------------------------------------------------
# Kernel 2: larger vocab -> VMEM-resident grouped row gather.
# ---------------------------------------------------------------------------
def _embed_gather_kernel(ids_ref, table_ref, out_ref, *, tok, group, scale):
    # ids_ref  : SMEM (n_pad,) int32  (scalar prefetch)
    # table_ref: VMEM (vocab, d_model), resident
    # out_ref  : VMEM (tok, d_model)
    base = pl.multiple_of(pl.program_id(0) * tok, tok)

    def body(g, carry):
        off = pl.multiple_of(g * group, group)
        # `group` independent row gathers in flight per iteration.
        rows = [table_ref[pl.ds(ids_ref[base + off + r], 1), :]
                for r in range(group)]
        tile = jnp.concatenate(rows, axis=0)                     # (group, d_model)
        # Scale once per assembled tile; one aligned, unmasked store.
        out_ref[pl.ds(off, group), :] = (tile * scale).astype(out_ref.dtype)
        return carry

    n_groups = tok // group
    lax.fori_loop(0, n_groups, body, 0, unroll=min(4, n_groups))


# ---------------------------------------------------------------------------
# Wrapper
# ---------------------------------------------------------------------------
def embedding_forward(token_ids, table, d_model=None):
    """token_ids: int array (any shape); table: (vocab, d_model) float.

    Returns table[token_ids] * sqrt(d_model) with shape token_ids.shape + (d_model,).
    """
    vocab, dm = table.shape
    if d_model is None:
        d_model = dm
    scale = float(math.sqrt(d_model))

    lead_shape = token_ids.shape
    n_tokens = 1
    for s in lead_shape:
        n_tokens *= int(s)

    # Clamp ids so an out-of-range id can never cause an OOB VMEM read.
    # TODO(synk): PyTorch nn.Embedding raises on OOB ids; we clamp instead.
    flat_ids = jnp.clip(token_ids.reshape(n_tokens).astype(jnp.int32), 0, vocab - 1)

    itemsize = jnp.dtype(table.dtype).itemsize
    # Sub-32-bit dtypes pack 2 rows per sublane -> group / round in 16s.
    group = 8 if itemsize >= 4 else 16

    use_mxu = vocab <= 1024

    # Token-block sizing: big blocks amortize the ~0.35us/step overhead, but
    # keep >= 2 blocks when possible so both TensorCores are used on v7x.
    target = 512 if use_mxu else 2048
    if n_tokens >= 2 * group:
        n_blocks = max(2, _cdiv(n_tokens, target))
    else:
        n_blocks = 1
    tok = min(target, _round_up(_cdiv(n_tokens, n_blocks), group))
    tok = max(tok, group)
    n_pad = _round_up(n_tokens, tok)
    if n_pad != n_tokens:
        flat_ids = jnp.pad(flat_ids, (0, n_pad - n_tokens))
    grid = (n_pad // tok,)

    # --- generation-aware VMEM budget --------------------------------------
    table_bytes = vocab * dm * itemsize
    out_blk_bytes = tok * dm * itemsize
    try:
        vmem_cap = int(pltpu.get_tpu_info().vmem_capacity_bytes)
    except Exception:
        vmem_cap = 64 << 20                     # conservative (v7x per-TC)
    resident_cap = (vmem_cap * 3) // 4          # headroom for out blocks/scratch
    if table_bytes > resident_cap:
        # TODO(synk): for tables beyond the resident cap, keep the table in HBM
        # (memory_space=pl.ANY) and run a deeply pipelined per-row DMA gather
        # (pltpu.make_async_copy driven by the scalar-prefetched ids).
        raise NotImplementedError(
            f"embedding table ({table_bytes >> 20} MiB) exceeds resident VMEM "
            f"budget ({resident_cap >> 20} MiB)")

    onehot_bytes = tok * vocab * itemsize if use_mxu else 0
    needed = (table_bytes              # single-buffered resident table
              + 2 * out_blk_bytes      # double-buffered output block
              + 2 * tok * 4            # ids block (MXU path)
              + onehot_bytes           # one-hot intermediate (MXU path)
              + (8 << 20))             # compiler scratch headroom
    vmem_limit = int(min(vmem_cap, max(32 << 20, needed)))

    compiler_params = pltpu.CompilerParams(
        dimension_semantics=("parallel",),      # independent token blocks
        vmem_limit_bytes=vmem_limit,
    )
    out_shape = jax.ShapeDtypeStruct((n_pad, dm), table.dtype)

    if use_mxu:
        grid_spec = pltpu.PrefetchScalarGridSpec(
            num_scalar_prefetch=0,
            grid=grid,
            in_specs=[
                pl.BlockSpec((tok, 1), lambda i: (i, 0)),
                _resident_table_spec((vocab, dm), lambda i: (0, 0)),
            ],
            out_specs=pl.BlockSpec((tok, dm), lambda i: (i, 0)),
        )
        out_flat = pl.pallas_call(
            functools.partial(_embed_onehot_kernel, scale=scale),
            out_shape=out_shape,
            grid_spec=grid_spec,
            compiler_params=compiler_params,
        )(flat_ids.reshape(n_pad, 1), table)
    else:
        grid_spec = pltpu.PrefetchScalarGridSpec(
            num_scalar_prefetch=1,              # ids -> SMEM
            grid=grid,
            in_specs=[
                _resident_table_spec((vocab, dm), lambda i, ids: (0, 0)),
            ],
            out_specs=pl.BlockSpec((tok, dm), lambda i, ids: (i, 0)),
        )
        out_flat = pl.pallas_call(
            functools.partial(_embed_gather_kernel, tok=tok, group=group,
                              scale=scale),
            out_shape=out_shape,
            grid_spec=grid_spec,
            compiler_params=compiler_params,
        )(flat_ids, table)

    return out_flat[:n_tokens].reshape(*lead_shape, dm)


if __name__ == "__main__":
    d_model = 128
    batch, seq = 2, 8

    key = jax.random.PRNGKey(0)
    k1, k2, k3, k4 = jax.random.split(key, 4)

    # --- small vocab: exercises the one-hot MXU path ------------------------
    vocab_small = 32
    table_s = jax.random.normal(k1, (vocab_small, d_model), dtype=jnp.float32)
    ids_s = jax.random.randint(k2, (batch, seq), 0, vocab_small, dtype=jnp.int32)
    out_s = jax.block_until_ready(embedding_forward(ids_s, table_s, d_model))
    ref_s = table_s[ids_s] * math.sqrt(d_model)
    assert out_s.shape == (batch, seq, d_model)
    assert jnp.allclose(out_s, ref_s, atol=1e-4, rtol=1e-4)

    # --- larger vocab: exercises the resident-table grouped gather path -----
    vocab_large = 4096
    table_l = jax.random.normal(k3, (vocab_large, d_model), dtype=jnp.float32)
    ids_l = jax.random.randint(k4, (batch, seq), 0, vocab_large, dtype=jnp.int32)
    out_l = jax.block_until_ready(embedding_forward(ids_l, table_l, d_model))
    ref_l = table_l[ids_l] * math.sqrt(d_model)
    assert out_l.shape == (batch, seq, d_model)
    assert jnp.allclose(out_l, ref_l, atol=1e-5, rtol=1e-5)

    print("KERNEL_OK")
</pallas_src>

<mosaic_0001>
module attributes {stable_mosaic.version = 11 : i64} {
  func.func @_embed_onehot_kernel(%arg0: i32, %arg1: memref<8x1xi32, #tpu.memory_space<vmem>>, %arg2: memref<32x128xf32, #tpu.memory_space<vmem>>, %arg3: memref<8x128xf32, #tpu.memory_space<vmem>>) attributes {dimension_semantics = [#tpu.dimension_semantics<parallel>], iteration_bounds = array<i64: 2>, scalar_prefetch = 0 : i64, scratch_operands = 0 : i64, tpu.core_type = #tpu.core_type<tc>, window_params = [{transform_indices = @transform_0, window_bounds = array<i64: 8, 1>}, {pipeline_mode = #tpu.pipeline_mode<synchronous>, transform_indices = @transform_1, window_bounds = array<i64: 32, 128>}, {transform_indices = @transform_2, window_bounds = array<i64: 8, 128>}]} {
    %c0 = arith.constant 0 : index
    %c0_0 = arith.constant 0 : index
    %0 = vector.load %arg1[%c0, %c0_0] : memref<8x1xi32, #tpu.memory_space<vmem>>, vector<8x1xi32>
    %1 = tpu.iota {dimensions = array<i32: 1>} : vector<8x32xi32>
    %2 = vector.broadcast %0 : vector<8x1xi32> to vector<8x32xi32>
    %3 = arith.cmpi eq, %2, %1 : vector<8x32xi32>
    %4 = arith.extui %3 : vector<8x32xi1> to vector<8x32xi32>
    %5 = arith.sitofp %4 : vector<8x32xi32> to vector<8x32xf32>
    %c0_1 = arith.constant 0 : index
    %c0_2 = arith.constant 0 : index
    %6 = vector.load %arg2[%c0_1, %c0_2] : memref<32x128xf32, #tpu.memory_space<vmem>>, vector<32x128xf32>
    %cst = arith.constant dense<0.000000e+00> : vector<8x128xf32>
    %7 = tpu.matmul %5, %6, %cst {dimension_numbers = #tpu.dot_dimension_numbers<[1], [0], [0], [1], [0, 0, 1, 1], [], []>, precision = #tpu.contract_precision<fp32>} : vector<8x32xf32>, vector<32x128xf32>, vector<8x128xf32> -> vector<8x128xf32>
    %cst_3 = arith.constant 11.3137083 : f32
    %8 = vector.broadcast %cst_3 : f32 to vector<8x128xf32>
    %9 = arith.mulf %7, %8 : vector<8x128xf32>
    %c0_4 = arith.constant 0 : index
    %c0_5 = arith.constant 0 : index
    %10 = vector.load %arg3[%c0_4, %c0_5] : memref<8x128xf32, #tpu.memory_space<vmem>>, vector<8x128xf32>
    tpu.vector_store %arg3[%c0_4, %c0_5], %9 {strides = array<i32>} : memref<8x128xf32, #tpu.memory_space<vmem>>, vector<8x128xf32>,
    return
  }
  func.func @transform_0(%arg0: i32) -> (i32, i32) {
    %c0_i32 = arith.constant 0 : i32
    %c0_i32_0 = arith.constant 0 : i32
    return %arg0, %c0_i32 : i32, i32
  }
  func.func @transform_1(%arg0: i32) -> (i32, i32) {
    %c0_i32 = arith.constant 0 : i32
    %c0_i32_0 = arith.constant 0 : i32
    %c0_i32_1 = arith.constant 0 : i32
    return %c0_i32, %c0_i32_0 : i32, i32
  }
  func.func @transform_2(%arg0: i32) -> (i32, i32) {
    %c0_i32 = arith.constant 0 : i32
    %c0_i32_0 = arith.constant 0 : i32
    return %arg0, %c0_i32 : i32, i32
  }
}

</mosaic_0001>

<bundles_post_ra>
// kernel: tpu_custom_call.1
= control target key start
LH: loop header
LB: loop body
LE: loop exit
PB: predicated region body
PF: predicated region fallthrough
CT: control target
= control target key end

     0   :  { %7 = vsyncpa [#allocation3], 0  ;;  %s731_s0 = inlined_call_operand.vmem [shape: s32[16,1], index: 0, kind: input, shape index: {}]   ;;  %s732_s1 = inlined_call_operand.hbm [shape: f32[32,128], index: 1, kind: input, shape index: {}]   ;;  %s733_s2 = inlined_call_operand.hbm [shape: f32[16,128], index: 2, kind: output, shape index: {}]  }
   0x1   :  { %8 = vsyncpa [#allocation4], 0 }
   0x2   :  { %10 = vsyncpa [#allocation4 + $0x1], 0  ;;  %s636_s9 = smov 0   ;;  %s638_s10 = smov 0  }
   0x3   :  { %s640_s11 = smov 0   ;;  %s642_s12 = smov 0  }
   0x4 LB: > { %s657_s13 = sadd.s32 4294967295, %s614_s12   ;;  %s447_s14 = sadd.s32 4294967294, %s614_s12   ;;  %s614_s12 = sphi %s642_s12, %s739_s12   ;;  %s610_s11 = sphi %s640_s11, %s738_s11   ;;  %s606_s10 = sphi %s638_s10, %s737_s10   ;;  %s602_s9 = sphi %s636_s9, %s736_s9  }
   0x5   : > { %s661_s15 = sadd.s32 1, %s614_s12   ;;  %s70_s16 = sadd.s32 1, %s610_s11 }
   0x6   : > { %s67_s17 = ssub.s32 %s614_s12, %s661_s15  ;;  %p80_p0 = scmp.ne.s32.totalorder %s610_s11, %s606_s10 }
   0x7   : > { %p68_p1 = scmp.eq.s32.totalorder %s67_s17, 0  ;;  %p81_p2 = scmp.eq.s32.totalorder %s657_s13, 1 }
   0x8   : > { %p86_p3 = scmp.ne.s32.totalorder %s606_s10, %s602_s9  ;;  %p87_p4 = scmp.eq.s32.totalorder %s447_s14, 1 }
   0x9   : > { %s672_s18 = scalar_select %p68_p1, %s610_s11, %s70_s16  }
   0xa   : > { %p674_p5 = por %p81_p2, %p80_p0  ;;  %p678_p6 = por %p87_p4, %p86_p3 }
   0xb   : > { %p448_p7 = scmp.ge.s32.totalorder %s614_s12, 1  ;;  %p94_p8 = scmp.lt.s32.totalorder %s614_s12, 3 }
   0xc   : > { %p477_p9 = scmp.eq.s32.totalorder %s657_s13, 0  ;;  %s105_s23 = sshll.u32 %s732_s1, 4  ;;  %s106_s23 = int_to_ptr.hbm [resolvable:$true] %s105_s23 }
   0xd   : > { %p95_p10 = pnand %p448_p7, %p94_p8  ;;  %s616_s24 = smov [#allocation2]  }
   0xe   : > { %s107_s25 = sshll.u32 %s616_s24, 4  ;;  %s617_s26 = smov 128   ;;  %s108_s25 = int_to_ptr.vmem [resolvable:$true] %s107_s25 }
   0xf   : > { %p469_p11 = pneg %p95_p10  ;;  %s618_s27 = smov 8  }
  0x10   : > { %130 = sbr.rel (%p95_p10) target bundleno = 298 (0x12a), region = 28 }
  0x11   : > { %p470_p12 = pnand %p477_p9, %p469_p11 }
  0x13   : > { %472 = dma.hbm_to_vmem [thread:$0]  (!%p470_p12), %s106_s23, 512, %s108_s25, [#allocation3], %s617_s26, %s617_s26, %s618_s27  }
  0x15   : > { %593 = dma.done.wait (%p477_p9), [#allocation3], 512  }
  0x16   : > { %595 = vsyncadd (%p477_p9), [#allocation3], 4294966784  ;;  %p152_p13 = scmp.lt.s32.totalorder %s657_s13, 1  ;;  %v619_v0 = vmov 0   ;;  %v168_v2 = vld [vmem:[#allocation2 + $0x18] sm:$0xff]  ;;  %v167_v3 = vld [vmem:[#allocation2 + $0x10] sm:$0xff]  ;;  %v157_v26 = vlaneseq }
  0x17   : > { %517 = vset.pattern.permute.xlu0 %v619_v0  ;;  %v185_v4 = vand.u32 4294901760, %v168_v2  ;;  %v187_v5 = vand.u32 4294901760, %v167_v3  ;;  %v166_v6 = vld [vmem:[#allocation2 + $0x8] sm:$0xff]  ;;  %v165_v20 = vld [vmem:[#allocation2] sm:$0xff]  ;;  %vm169_vm0 = vcmask 261120   ;;  %v620_v29 = vmov 0.0  }
  0x18   : > { %s153_s28 = scalar_select %p152_p13, %s657_s13, 1  ;;  %v189_v7 = vand.u32 4294901760, %v166_v6  ;;  %v191_v21 = vand.u32 4294901760, %v165_v20  ;;  %v158_v27 = vand.u32 127, %v157_v26 }
  0x19   : > { %v215_v8 = vsub.f32 %v168_v2, %v185_v4  ;;  %v221_v9 = vsub.f32 %v167_v3, %v187_v5  ;;  %286 = vmatpush.msra.mxu3 %v185_v4  ;;  %186 = vmatpush.msra.mxu0 %v185_v4  ;;  %s149_s5 = sand.u32 1, %s606_s10   ;;  %s460_s7 = sshll.u32 %s657_s13, 3 }
  0x1a   : > { %s454_s29 = sshll.u32 %s153_s28, 3  ;;  %v227_v10 = vsub.f32 %v166_v6, %v189_v7  ;;  %v233_v22 = vsub.f32 %v165_v20, %v191_v21  ;;  %s453_s6 = sshll.u32 %s149_s5, 3 }
  0x1b   : > { %s155_s4 = scalar_lea.vmem %s731_s0, %s454_s29  ;;  %v216_v11 = vand.u32 4294901760, %v215_v8  ;;  %v222_v12 = vand.u32 4294901760, %v221_v9  ;;  %257 = vmatpush.msra.mxu2 %v215_v8  ;;  %288 = vmatpush.msra.mxu3 %v187_v5  ;;  %s371_s16 = scalar_lea.hbm %s733_s2, %s460_s7 }
  0x1c   : > { %v156_v1 = vld [vmem:[%s155_s4] sm:$0xff]  ;;  %v228_v13 = vand.u32 4294901760, %v227_v10  ;;  %188 = vmatpush.msra.mxu0 %v187_v5  ;;  %v234_v23 = vand.u32 4294901760, %v233_v22  ;;  %s151_s17 = scalar_lea.vmem [#allocation5], %s453_s6  ;;  %s375_s22 = sshll.u32 %s371_s16, 4  ;;  %s376_s22 = int_to_ptr.hbm [resolvable:$true] %s375_s22 }
  0x1d   : > { %160 = vperm.xlu0 %517, %v156_v1   ;;  %v217_v14 = vsub.f32 %v215_v8, %v216_v11  ;;  %v223_v15 = vsub.f32 %v221_v9, %v222_v12  ;;  %260 = vmatpush.msra.mxu2 %v221_v9  ;;  %s373_s21 = sshll.u32 %s151_s17, 4  ;;  %s361_s23 = scalar_lea.sflag [#allocation4], %s149_s5  ;;  %s374_s21 = int_to_ptr.vmem [resolvable:$true] %s373_s21 }
  0x1e   : > { %290 = vmatpush.msra.mxu3 %v189_v7  ;;  %v229_v16 = vsub.f32 %v227_v10, %v228_v13  ;;  %190 = vmatpush.msra.mxu0 %v189_v7  ;;  %v235_v24 = vsub.f32 %v233_v22, %v234_v23  ;;  %s562_s13 = sshra.s32 %s376_s22, 4  ;;  %s568_s27 = scalar_lea.hbm %s733_s2, 16  ;;  %s563_s13 = int_to_ptr.hbm [resolvable:$true] %s562_s13 }
  0x1f   : > { %v218_v17 = vand.u32 4294901760, %v217_v14  ;;  %v224_v18 = vand.u32 4294901760, %v223_v15  ;;  %263 = vmatpush.msra.mxu2 %v227_v10  ;;  %s564_s24 = scalar_lea.hbm %s563_s13, 8  ;;  %p569_p3 = scmp.lt.s32.totalorder %s563_s13, %s733_s2 }
  0x20   : > { %v230_v19 = vand.u32 4294901760, %v229_v16  ;;  %292 = vmatpush.msra.mxu3 %v191_v21  ;;  %192 = vmatpush.msra.mxu0 %v191_v21  ;;  %v236_v25 = vand.u32 4294901760, %v235_v24  ;;  %p565_p0 = scmp.ne.s32.totalorder %s563_s13, %s564_s24  ;;  %p570_p4 = scmp.lt.s32.totalorder %s568_s27, %s564_s24 }
  0x21   : > { %219 = vmatpush.msra.mxu1 %v218_v17  ;;  %266 = vmatpush.msra.mxu2 %v233_v22 }
  0x22   : > { %315 = vmatpush.msrb.mxu0 %v216_v11  ;;  %p566_p1 = pnand %p565_p0, %p674_p5  ;;  %p571_p7 = por %p570_p4, %p569_p3 }
  0x23   : > { %225 = vmatpush.msra.mxu1 %v224_v18 }
  0x24   : > { %319 = vmatpush.msrb.mxu0 %v222_v12  ;;  %p567_p2 = pneg %p566_p1 }
  0x25   : > { %231 = vmatpush.msra.mxu1 %v230_v19 }
  0x26   : > { %323 = vmatpush.msrb.mxu0 %v228_v13  ;;  %p572_p8 = pnand %p571_p7, %p567_p2 }
  0x27   : > { %237 = vmatpush.msra.mxu1 %v236_v25 }
  0x28   : > { %327 = vmatpush.msrb.mxu0 %v234_v23 }
  0x29   : > { %346 = vmatpush.msrb.mxu1 %v185_v4 }
  0x2b   : > { %348 = vmatpush.msrb.mxu1 %v187_v5 }
  0x2d   : > { %350 = vmatpush.msrb.mxu1 %v189_v7 }
  0x2f   : > { %352 = vmatpush.msrb.mxu1 %v191_v21 }
  0x8f   : > { %v161_v28 = vpop.permute.xlu0 %160 }
  0x90   : > { %vm162_vm1 = vcmp.eq.s32.totalorder %v161_v28, %v158_v27 }
  0x91   : > { %v455_v30 = vsel %vm162_vm1, 1.0, %v620_v29 }
  0x92   : > { %456 = vmatmul.msk.f32.vlgmr.msra.gmra.mxu1 %vm169_vm0, %v455_v30  ;;  %v171_v31 = vsel %vm169_vm0, %v455_v30, 0 }
  0x93   : > { %v194_v32 = vsub.f32 %v171_v31, %v171_v31 }
  0x95   : > { %269 = vmatmul.f32.vlgmr.msra.gmra.mxu2 %v194_v32  ;;  %v195_v33 = vand.u32 4294901760, %v194_v32 }
  0x97   : > { %296 = vmatmul.f32.vlgmr.msra.gmra.mxu3 %v195_v33  ;;  %v196_v34 = vsub.f32 %v194_v32, %v195_v33 }
  0x99   : > { %v197_v35 = vand.u32 4294901760, %v196_v34 }
  0x9a   : > { %458 = vmatmul.msk.f32.vlgmr.msrb.gmra.mxu1 %vm169_vm0, %v455_v30 }
  0x9b   : > { %198 = vmatmul.f32.vlgmr.msra.gmra.mxu0 %v197_v35 }
  0xa3   : > { %457 = vmatmul.msk.f32.vlgmr.msrb.gmra.mxu0 %vm169_vm0, %v455_v30 }
 0x10f   : > { %v240_v36 = vpop.f32.mrf.mxu1 }
 0x117   : > { %v355_v45 = vpop.f32.mrf.mxu1 }
 0x118   : > { %v199_v37 = vpop.f32.mrf.mxu0  ;;  %v270_v39 = vpop.f32.mrf.mxu2 }
 0x119   : > { %v241_v38 = vadd.f32 %v240_v36, %v199_v37 }
 0x11a   : > { %v297_v41 = vpop.f32.mrf.mxu3 }
 0x11b   : > { %v271_v40 = vadd.f32 %v270_v39, %v241_v38 }
 0x11d   : > { %v298_v42 = vadd.f32 %v297_v41, %v271_v40 }
 0x120   : > { %v330_v43 = vpop.f32.mrf.mxu0 }
 0x121   : > { %v331_v44 = vadd.f32 %v330_v43, %v298_v42 }
 0x123   : > { %v356_v46 = vadd.f32 %v355_v45, %v331_v44 }
 0x125   : > { %v358_v47 = vmul.f32 11.313708, %v356_v46 }
 0x127   : > { %359 = vst [vmem:[%s151_s17] sm:$0xff] %v358_v47 }
 0x128   : > { %575 = shalt.err (!%p572_p8)
}
 0x129   : > { %467 = dma.vmem_to_hbm [thread:$0]  (%p674_p5), %s374_s21, 128, %s376_s22, %s361_s23  }
 0x12a PF: > { %p479_p9 = scmp.ge.s32.totalorder %s614_s12, 2  ;;  %s387_s30 = sand.u32 1, %s602_s9  }
 0x12b   : > { %s388_s3 = scalar_lea.sflag [#allocation4], %s387_s30 }
 0x12c   : > { %p474_p10 = pnand %p479_p9, %p678_p6 }
 0x12e   : > { %p475_p11 = pneg %p474_p10 }
 0x130   : > { %597 = dma.done.wait (%p475_p11), %s388_s3, 128  }
 0x131   : > { %599 = vsyncadd (%p475_p11), %s388_s3, 4294967168  ;;  %p13_p12 = scmp.ge.s32.totalorder %s661_s15, 4   ;;  %s736_s9 = smov %s606_s10 }
 0x132   : > { %s737_s10 = smov %s610_s11  ;;  %s738_s11 = smov %s672_s18 }
 0x133   : > { %s739_s12 = smov %s661_s15  ;;  %15 = sbr.rel (!%p13_p12) target bundleno = 4 (0x4), region = 68 }
 0x138   :  { %394 = vsyncpa [#allocation3], 1 }
 0x139   :  { %396 = vsyncpa [#allocation3 + $0x1], 1 }
 0x13a   :  { %397 = vsyncpa [#allocation4], 1 }
 0x13b   :  { %399 = vsyncpa [#allocation4 + $0x1], 1 }

</bundles_post_ra>
